<compile_context>
chip_gen: v6e
topology: v6e:2x2x1
jax: 0.10.0
libtpu: 0.0.40
codegen_flags: <defaults>
</compile_context>

<pallas_src>
import functools
import math

import jax
import jax.numpy as jnp
from jax.experimental import pallas as pl
from jax.experimental.pallas import tpu as pltpu


def transformer_layer_kernel(
    x_ref,       # (B*S, E)     f32 activations, batch flattened into M
    wqkv_ref,    # (E, 3*H*D)   fused Q|K|V projection weight (matmul dtype, Q pre-scaled)
    wo_ref,      # (H*D, E)     fused output projection weight (matmul dtype)
    w1_ref,      # (E, F)       FFN up weight (matmul dtype)
    w2_ref,      # (F, E)       FFN down weight (matmul dtype)
    vec_ref,     # (8, W)       f32 packed small vectors (biases / LN gains), row-sliced
    out_ref,     # (B*S, E)     f32
    *, B, S, H, D, E, F,
):
    HD = H * D
    eps = 1e-5
    cd = wqkv_ref.dtype                      # matmul input dtype (bf16 or f32)

    x = x_ref[...]                           # (BS, E) f32

    # ---- packed small vectors: one DMA, sliced by row in registers ----
    vecs = vec_ref[...]                      # (8, W) f32
    b_qkv = vecs[0:1, :3 * HD]               # Q part already scaled by 1/sqrt(D)
    b_o   = vecs[1:2, :E]
    g1    = vecs[2:3, :E]
    be1   = vecs[3:4, :E]
    b1    = vecs[4:5, :F]
    b2    = vecs[5:6, :E]
    g2    = vecs[6:7, :E]
    be2   = vecs[7:8, :E]

    # ---- fused QKV projection: one lane-dense MXU matmul, f32 accumulation ----
    qkv = jnp.dot(x.astype(cd), wqkv_ref[...],
                  preferred_element_type=jnp.float32) + b_qkv      # (BS, 3HD) f32
    q_all = qkv[:, 0:HD]
    k_all = qkv[:, HD:2 * HD]
    v_all = qkv[:, 2 * HD:3 * HD]

    # ---- attention core: short static head loop, score/PV einsums batched over B.
    # Per-head outputs stay in vregs and are concatenated (no scratch round-trip).
    heads = []
    for h in range(H):
        sl = slice(h * D, (h + 1) * D)
        qh = q_all[:, sl].reshape(B, S, D)   # leading-dim split only (free)
        kh = k_all[:, sl].reshape(B, S, D)
        vh = v_all[:, sl].reshape(B, S, D)
        # scale already folded into wq/bq in the wrapper
        s = jnp.einsum("bqd,bkd->bqk", qh.astype(cd), kh.astype(cd),
                       preferred_element_type=jnp.float32)         # (B, S, S) f32
        s = s - jnp.max(s, axis=-1, keepdims=True)
        p = jnp.exp(s)
        # EUP approximate reciprocal instead of a VALU divide.
        p = p * pl.reciprocal(jnp.sum(p, axis=-1, keepdims=True), approx=True)
        oh = jnp.einsum("bqk,bkd->bqd", p.astype(cd), vh.astype(cd),
                        preferred_element_type=jnp.float32)        # (B, S, D) f32
        heads.append(oh.reshape(B * S, D))
    attn_in = jnp.concatenate(heads, axis=-1)                      # (BS, HD) f32, in vregs

    # ---- fused output projection over concatenated heads: one matmul ----
    attn = jnp.dot(attn_in.astype(cd), wo_ref[...],
                   preferred_element_type=jnp.float32) + b_o       # (BS, E) f32

    # ---- residual + LayerNorm 1 (single-pass; dropout_1 == identity in eval) ----
    y = x + attn
    mu = jnp.mean(y, axis=-1, keepdims=True)
    ms = jnp.mean(y * y, axis=-1, keepdims=True)
    y = (y - mu) * jax.lax.rsqrt(ms - mu * mu + eps) * g1 + be1

    # ---- FFN: Linear -> ReLU -> Linear on M = B*S rows ----
    h1 = jnp.dot(y.astype(cd), w1_ref[...],
                 preferred_element_type=jnp.float32) + b1
    h1 = jnp.maximum(h1, 0.0)
    f = jnp.dot(h1.astype(cd), w2_ref[...],
                preferred_element_type=jnp.float32) + b2

    # ---- residual + LayerNorm 2 (single-pass; dropout_2 == identity in eval) ----
    z = y + f
    mu2 = jnp.mean(z, axis=-1, keepdims=True)
    ms2 = jnp.mean(z * z, axis=-1, keepdims=True)
    out_ref[...] = (z - mu2) * jax.lax.rsqrt(ms2 - mu2 * mu2 + eps) * g2 + be2


def transformer_layer(x, params, *, matmul_dtype=jnp.bfloat16):
    """x: (B, S, E) float32.  params: per-head weights matching the PyTorch module.

    matmul_dtype=jnp.bfloat16 (default) uses MXU-native bf16 matmul inputs with f32
    accumulation — native on v5e, v6e and v7x.  LayerNorm/softmax math stays f32.
    matmul_dtype=jnp.float32 gives an exact validation path.
    """
    B, S, E = x.shape
    H, _, D = params["wq"].shape
    HD = H * D
    F = params["w1"].shape[1]
    scale = 1.0 / math.sqrt(D)

    # --- wrapper-side weight fusion / pre-scaling / pre-casting (plain XLA ops) ---
    def cat_heads(w):                        # (H, E, D) -> (E, H*D)
        return jnp.transpose(w, (1, 0, 2)).reshape(E, HD)

    w_qkv = jnp.concatenate(
        [cat_heads(params["wq"]) * scale,    # fold 1/sqrt(D) into the Q columns
         cat_heads(params["wk"]),
         cat_heads(params["wv"])], axis=1).astype(matmul_dtype)     # (E, 3HD)
    w_o = params["wo"].reshape(HD, E).astype(matmul_dtype)          # (HD, E)
    w1 = params["w1"].astype(matmul_dtype)                          # (E, F)
    w2 = params["w2"].astype(matmul_dtype)                          # (F, E)

    b_qkv = jnp.concatenate(
        [params["bq"].reshape(1, HD) * scale,                       # scale Q bias too
         params["bk"].reshape(1, HD),
         params["bv"].reshape(1, HD)], axis=1)                      # (1, 3HD) f32

    # Pack the 8 small f32 vectors into one (8, W) array (one DMA, row-sliced in-kernel).
    W = max(3 * HD, E, F)
    W = ((W + 127) // 128) * 128

    def row(v):
        v = v.reshape(1, -1)
        return jnp.pad(v, ((0, 0), (0, W - v.shape[1])))

    vecs = jnp.concatenate(
        [row(b_qkv), row(params["bo"]), row(params["g1"]), row(params["be1"]),
         row(params["b1"]), row(params["b2"]), row(params["g2"]), row(params["be2"])],
        axis=0)                                                     # (8, W) f32

    x2 = x.reshape(B * S, E)   # flatten batch into the matmul M dimension

    # Gridless: the whole (toy-sized) problem is VMEM-resident — no per-step
    # pipeline overhead, no default weight double-buffering.
    vmem = pl.BlockSpec(memory_space=pltpu.MemorySpace.VMEM)
    kernel = functools.partial(transformer_layer_kernel,
                               B=B, S=S, H=H, D=D, E=E, F=F)
    out2 = pl.pallas_call(
        kernel,
        out_shape=jax.ShapeDtypeStruct((B * S, E), jnp.float32),
        in_specs=[vmem] * 6,
        out_specs=vmem,
    )(x2, w_qkv, w_o, w1, w2, vecs)
    return out2.reshape(B, S, E)


def reference(x, p):
    """Pure-JAX reference mirroring the PyTorch forward (eval mode)."""
    B, S, E = x.shape
    H, _, D = p["wq"].shape
    eps = 1e-5
    attn = jnp.broadcast_to(p["bo"], (B, S, E)).astype(jnp.float32)
    for h in range(H):
        Q = x @ p["wq"][h] + p["bq"][h]
        K = x @ p["wk"][h] + p["bk"][h]
        V = x @ p["wv"][h] + p["bv"][h]
        s = jnp.einsum("bqd,bkd->bqk", Q, K) / math.sqrt(D)
        pr = jax.nn.softmax(s, axis=-1)
        attn = attn + (pr @ V) @ p["wo"][h]

    def ln(v, g, b):
        mu = jnp.mean(v, -1, keepdims=True)
        var = jnp.mean((v - mu) ** 2, -1, keepdims=True)
        return (v - mu) * jax.lax.rsqrt(var + eps) * g + b

    y = ln(x + attn, p["g1"], p["be1"])
    f = jnp.maximum(y @ p["w1"] + p["b1"], 0.0) @ p["w2"] + p["b2"]
    return ln(y + f, p["g2"], p["be2"])


if __name__ == "__main__":
    B, S, E = 2, 8, 32          # batch, seq, embed_size
    H = 4                       # num_heads
    D = E // H                  # per-head embed dim
    F = 64                      # ffn_hidden_size

    key = jax.random.PRNGKey(0)
    ks = jax.random.split(key, 16)
    sc = 0.1
    params = {
        "wq": sc * jax.random.normal(ks[0], (H, E, D), jnp.float32),
        "bq": sc * jax.random.normal(ks[1], (H, 1, D), jnp.float32),
        "wk": sc * jax.random.normal(ks[2], (H, E, D), jnp.float32),
        "bk": sc * jax.random.normal(ks[3], (H, 1, D), jnp.float32),
        "wv": sc * jax.random.normal(ks[4], (H, E, D), jnp.float32),
        "bv": sc * jax.random.normal(ks[5], (H, 1, D), jnp.float32),
        "wo": sc * jax.random.normal(ks[6], (H, D, E), jnp.float32),
        "bo": sc * jax.random.normal(ks[7], (1, E), jnp.float32),
        "g1": jnp.ones((1, E), jnp.float32),
        "be1": jnp.zeros((1, E), jnp.float32),
        "w1": sc * jax.random.normal(ks[8], (E, F), jnp.float32),
        "b1": sc * jax.random.normal(ks[9], (1, F), jnp.float32),
        "w2": sc * jax.random.normal(ks[10], (F, E), jnp.float32),
        "b2": sc * jax.random.normal(ks[11], (1, E), jnp.float32),
        "g2": jnp.ones((1, E), jnp.float32),
        "be2": jnp.zeros((1, E), jnp.float32),
    }
    x = jax.random.normal(ks[12], (B, S, E), jnp.float32)

    ref = reference(x, params)

    # Exact-dtype validation path (f32 matmul inputs; approx reciprocal in softmax).
    out_f32 = jax.block_until_ready(transformer_layer(x, params, matmul_dtype=jnp.float32))
    assert out_f32.shape == (B, S, E)
    assert jnp.allclose(out_f32, ref, atol=2e-3, rtol=2e-3), "f32 path mismatch vs reference"

    # Default (performance) path: bf16 MXU matmul inputs, f32 accumulation.
    out = jax.block_until_ready(transformer_layer(x, params))
    assert out.shape == (B, S, E)
    assert jnp.allclose(out, ref, atol=3e-2, rtol=3e-2), "bf16 path mismatch vs reference"

    print("KERNEL_OK")
</pallas_src>

<mosaic_0001>
module attributes {stable_mosaic.version = 11 : i64} {
  func.func @transformer_layer_kernel(%arg0: memref<16x32xf32, #tpu.memory_space<vmem>>, %arg1: memref<32x96xf32, #tpu.memory_space<vmem>>, %arg2: memref<32x32xf32, #tpu.memory_space<vmem>>, %arg3: memref<32x64xf32, #tpu.memory_space<vmem>>, %arg4: memref<64x32xf32, #tpu.memory_space<vmem>>, %arg5: memref<8x128xf32, #tpu.memory_space<vmem>>, %arg6: memref<16x32xf32, #tpu.memory_space<vmem>>) attributes {dimension_semantics = [], scalar_prefetch = 0 : i64, scratch_operands = 0 : i64, tpu.core_type = #tpu.core_type<tc>} {
    %c0 = arith.constant 0 : index
    %c0_0 = arith.constant 0 : index
    %0 = vector.load %arg0[%c0, %c0_0] : memref<16x32xf32, #tpu.memory_space<vmem>>, vector<16x32xf32>
    %c0_1 = arith.constant 0 : index
    %c0_2 = arith.constant 0 : index
    %1 = vector.load %arg5[%c0_1, %c0_2] : memref<8x128xf32, #tpu.memory_space<vmem>>, vector<8x128xf32>
    %2 = vector.extract_strided_slice %1 {offsets = [0, 0], sizes = [1, 96], strides = [1, 1]} : vector<8x128xf32> to vector<1x96xf32>
    %3 = vector.extract_strided_slice %1 {offsets = [1, 0], sizes = [1, 32], strides = [1, 1]} : vector<8x128xf32> to vector<1x32xf32>
    %4 = vector.extract_strided_slice %1 {offsets = [2, 0], sizes = [1, 32], strides = [1, 1]} : vector<8x128xf32> to vector<1x32xf32>
    %5 = vector.extract_strided_slice %1 {offsets = [3, 0], sizes = [1, 32], strides = [1, 1]} : vector<8x128xf32> to vector<1x32xf32>
    %6 = vector.extract_strided_slice %1 {offsets = [4, 0], sizes = [1, 64], strides = [1, 1]} : vector<8x128xf32> to vector<1x64xf32>
    %7 = vector.extract_strided_slice %1 {offsets = [5, 0], sizes = [1, 32], strides = [1, 1]} : vector<8x128xf32> to vector<1x32xf32>
    %8 = vector.extract_strided_slice %1 {offsets = [6, 0], sizes = [1, 32], strides = [1, 1]} : vector<8x128xf32> to vector<1x32xf32>
    %9 = vector.extract_strided_slice %1 {offsets = [7, 0], sizes = [1, 32], strides = [1, 1]} : vector<8x128xf32> to vector<1x32xf32>
    %c0_3 = arith.constant 0 : index
    %c0_4 = arith.constant 0 : index
    %10 = vector.load %arg1[%c0_3, %c0_4] : memref<32x96xf32, #tpu.memory_space<vmem>>, vector<32x96xf32>
    %cst = arith.constant dense<0.000000e+00> : vector<16x96xf32>
    %11 = tpu.matmul %0, %10, %cst {dimension_numbers = #tpu.dot_dimension_numbers<[1], [0], [0], [1], [0, 0, 1, 1], [], []>} : vector<16x32xf32>, vector<32x96xf32>, vector<16x96xf32> -> vector<16x96xf32>
    %12 = vector.broadcast %2 : vector<1x96xf32> to vector<16x96xf32>
    %13 = arith.addf %11, %12 : vector<16x96xf32>
    %14 = vector.extract_strided_slice %13 {offsets = [0, 0], sizes = [16, 32], strides = [1, 1]} : vector<16x96xf32> to vector<16x32xf32>
    %15 = vector.extract_strided_slice %13 {offsets = [0, 32], sizes = [16, 32], strides = [1, 1]} : vector<16x96xf32> to vector<16x32xf32>
    %16 = vector.extract_strided_slice %13 {offsets = [0, 64], sizes = [16, 32], strides = [1, 1]} : vector<16x96xf32> to vector<16x32xf32>
    %17 = vector.extract_strided_slice %14 {offsets = [0, 0], sizes = [16, 8], strides = [1, 1]} : vector<16x32xf32> to vector<16x8xf32>
    %18 = vector.shape_cast %17 : vector<16x8xf32> to vector<2x8x8xf32>
    %19 = vector.extract_strided_slice %15 {offsets = [0, 0], sizes = [16, 8], strides = [1, 1]} : vector<16x32xf32> to vector<16x8xf32>
    %20 = vector.shape_cast %19 : vector<16x8xf32> to vector<2x8x8xf32>
    %21 = vector.extract_strided_slice %16 {offsets = [0, 0], sizes = [16, 8], strides = [1, 1]} : vector<16x32xf32> to vector<16x8xf32>
    %22 = vector.shape_cast %21 : vector<16x8xf32> to vector<2x8x8xf32>
    "tpu.trace_start"() <{level = 10 : i32, message = "bqd,bkd->bqk"}> : () -> ()
    %cst_5 = arith.constant dense<0.000000e+00> : vector<2x8x8xf32>
    %23 = tpu.matmul %18, %20, %cst_5 {dimension_numbers = #tpu.dot_dimension_numbers<[2], [2], [1], [1], [0, 0, 0, 1, 1, 1], [0], [0]>} : vector<2x8x8xf32>, vector<2x8x8xf32>, vector<2x8x8xf32> -> vector<2x8x8xf32>
    "tpu.trace_stop"() : () -> ()
    %cst_6 = arith.constant dense<0xFF800000> : vector<2x8xf32>
    %24 = vector.multi_reduction <maximumf>, %23, %cst_6 [2] : vector<2x8x8xf32> to vector<2x8xf32>
    %25 = vector.shape_cast %24 : vector<2x8xf32> to vector<2x8x1xf32>
    %26 = vector.broadcast %25 : vector<2x8x1xf32> to vector<2x8x8xf32>
    %27 = arith.subf %23, %26 : vector<2x8x8xf32>
    %28 = math.exp %27 : vector<2x8x8xf32>
    %cst_7 = arith.constant dense<0.000000e+00> : vector<2x8xf32>
    %29 = vector.multi_reduction <add>, %28, %cst_7 [2] : vector<2x8x8xf32> to vector<2x8xf32>
    %30 = vector.shape_cast %29 : vector<2x8xf32> to vector<2x8x1xf32>
    %31 = tpu.reciprocal %30 {approx = true} : vector<2x8x1xf32> -> vector<2x8x1xf32>
    %32 = vector.broadcast %31 : vector<2x8x1xf32> to vector<2x8x8xf32>
    %33 = arith.mulf %28, %32 : vector<2x8x8xf32>
    "tpu.trace_start"() <{level = 10 : i32, message = "bqk,bkd->bqd"}> : () -> ()
    %cst_8 = arith.constant dense<0.000000e+00> : vector<2x8x8xf32>
    %34 = tpu.matmul %33, %22, %cst_8 {dimension_numbers = #tpu.dot_dimension_numbers<[2], [1], [1], [2], [0, 0, 0, 1, 1, 2], [0], [0]>} : vector<2x8x8xf32>, vector<2x8x8xf32>, vector<2x8x8xf32> -> vector<2x8x8xf32>
    "tpu.trace_stop"() : () -> ()
    %35 = vector.shape_cast %34 : vector<2x8x8xf32> to vector<16x8xf32>
    %36 = vector.extract_strided_slice %14 {offsets = [0, 8], sizes = [16, 8], strides = [1, 1]} : vector<16x32xf32> to vector<16x8xf32>
    %37 = vector.shape_cast %36 : vector<16x8xf32> to vector<2x8x8xf32>
    %38 = vector.extract_strided_slice %15 {offsets = [0, 8], sizes = [16, 8], strides = [1, 1]} : vector<16x32xf32> to vector<16x8xf32>
    %39 = vector.shape_cast %38 : vector<16x8xf32> to vector<2x8x8xf32>
    %40 = vector.extract_strided_slice %16 {offsets = [0, 8], sizes = [16, 8], strides = [1, 1]} : vector<16x32xf32> to vector<16x8xf32>
    %41 = vector.shape_cast %40 : vector<16x8xf32> to vector<2x8x8xf32>
    "tpu.trace_start"() <{level = 10 : i32, message = "bqd,bkd->bqk"}> : () -> ()
    %cst_9 = arith.constant dense<0.000000e+00> : vector<2x8x8xf32>
    %42 = tpu.matmul %37, %39, %cst_9 {dimension_numbers = #tpu.dot_dimension_numbers<[2], [2], [1], [1], [0, 0, 0, 1, 1, 1], [0], [0]>} : vector<2x8x8xf32>, vector<2x8x8xf32>, vector<2x8x8xf32> -> vector<2x8x8xf32>
    "tpu.trace_stop"() : () -> ()
    %cst_10 = arith.constant dense<0xFF800000> : vector<2x8xf32>
    %43 = vector.multi_reduction <maximumf>, %42, %cst_10 [2] : vector<2x8x8xf32> to vector<2x8xf32>
    %44 = vector.shape_cast %43 : vector<2x8xf32> to vector<2x8x1xf32>
    %45 = vector.broadcast %44 : vector<2x8x1xf32> to vector<2x8x8xf32>
    %46 = arith.subf %42, %45 : vector<2x8x8xf32>
    %47 = math.exp %46 : vector<2x8x8xf32>
    %cst_11 = arith.constant dense<0.000000e+00> : vector<2x8xf32>
    %48 = vector.multi_reduction <add>, %47, %cst_11 [2] : vector<2x8x8xf32> to vector<2x8xf32>
    %49 = vector.shape_cast %48 : vector<2x8xf32> to vector<2x8x1xf32>
    %50 = tpu.reciprocal %49 {approx = true} : vector<2x8x1xf32> -> vector<2x8x1xf32>
    %51 = vector.broadcast %50 : vector<2x8x1xf32> to vector<2x8x8xf32>
    %52 = arith.mulf %47, %51 : vector<2x8x8xf32>
    "tpu.trace_start"() <{level = 10 : i32, message = "bqk,bkd->bqd"}> : () -> ()
    %cst_12 = arith.constant dense<0.000000e+00> : vector<2x8x8xf32>
    %53 = tpu.matmul %52, %41, %cst_12 {dimension_numbers = #tpu.dot_dimension_numbers<[2], [1], [1], [2], [0, 0, 0, 1, 1, 2], [0], [0]>} : vector<2x8x8xf32>, vector<2x8x8xf32>, vector<2x8x8xf32> -> vector<2x8x8xf32>
    "tpu.trace_stop"() : () -> ()
    %54 = vector.shape_cast %53 : vector<2x8x8xf32> to vector<16x8xf32>
    %55 = vector.extract_strided_slice %14 {offsets = [0, 16], sizes = [16, 8], strides = [1, 1]} : vector<16x32xf32> to vector<16x8xf32>
    %56 = vector.shape_cast %55 : vector<16x8xf32> to vector<2x8x8xf32>
    %57 = vector.extract_strided_slice %15 {offsets = [0, 16], sizes = [16, 8], strides = [1, 1]} : vector<16x32xf32> to vector<16x8xf32>
    %58 = vector.shape_cast %57 : vector<16x8xf32> to vector<2x8x8xf32>
    %59 = vector.extract_strided_slice %16 {offsets = [0, 16], sizes = [16, 8], strides = [1, 1]} : vector<16x32xf32> to vector<16x8xf32>
    %60 = vector.shape_cast %59 : vector<16x8xf32> to vector<2x8x8xf32>
    "tpu.trace_start"() <{level = 10 : i32, message = "bqd,bkd->bqk"}> : () -> ()
    %cst_13 = arith.constant dense<0.000000e+00> : vector<2x8x8xf32>
    %61 = tpu.matmul %56, %58, %cst_13 {dimension_numbers = #tpu.dot_dimension_numbers<[2], [2], [1], [1], [0, 0, 0, 1, 1, 1], [0], [0]>} : vector<2x8x8xf32>, vector<2x8x8xf32>, vector<2x8x8xf32> -> vector<2x8x8xf32>
    "tpu.trace_stop"() : () -> ()
    %cst_14 = arith.constant dense<0xFF800000> : vector<2x8xf32>
    %62 = vector.multi_reduction <maximumf>, %61, %cst_14 [2] : vector<2x8x8xf32> to vector<2x8xf32>
    %63 = vector.shape_cast %62 : vector<2x8xf32> to vector<2x8x1xf32>
    %64 = vector.broadcast %63 : vector<2x8x1xf32> to vector<2x8x8xf32>
    %65 = arith.subf %61, %64 : vector<2x8x8xf32>
    %66 = math.exp %65 : vector<2x8x8xf32>
    %cst_15 = arith.constant dense<0.000000e+00> : vector<2x8xf32>
    %67 = vector.multi_reduction <add>, %66, %cst_15 [2] : vector<2x8x8xf32> to vector<2x8xf32>
    %68 = vector.shape_cast %67 : vector<2x8xf32> to vector<2x8x1xf32>
    %69 = tpu.reciprocal %68 {approx = true} : vector<2x8x1xf32> -> vector<2x8x1xf32>
    %70 = vector.broadcast %69 : vector<2x8x1xf32> to vector<2x8x8xf32>
    %71 = arith.mulf %66, %70 : vector<2x8x8xf32>
    "tpu.trace_start"() <{level = 10 : i32, message = "bqk,bkd->bqd"}> : () -> ()
    %cst_16 = arith.constant dense<0.000000e+00> : vector<2x8x8xf32>
    %72 = tpu.matmul %71, %60, %cst_16 {dimension_numbers = #tpu.dot_dimension_numbers<[2], [1], [1], [2], [0, 0, 0, 1, 1, 2], [0], [0]>} : vector<2x8x8xf32>, vector<2x8x8xf32>, vector<2x8x8xf32> -> vector<2x8x8xf32>
    "tpu.trace_stop"() : () -> ()
    %73 = vector.shape_cast %72 : vector<2x8x8xf32> to vector<16x8xf32>
    %74 = vector.extract_strided_slice %14 {offsets = [0, 24], sizes = [16, 8], strides = [1, 1]} : vector<16x32xf32> to vector<16x8xf32>
    %75 = vector.shape_cast %74 : vector<16x8xf32> to vector<2x8x8xf32>
    %76 = vector.extract_strided_slice %15 {offsets = [0, 24], sizes = [16, 8], strides = [1, 1]} : vector<16x32xf32> to vector<16x8xf32>
    %77 = vector.shape_cast %76 : vector<16x8xf32> to vector<2x8x8xf32>
    %78 = vector.extract_strided_slice %16 {offsets = [0, 24], sizes = [16, 8], strides = [1, 1]} : vector<16x32xf32> to vector<16x8xf32>
    %79 = vector.shape_cast %78 : vector<16x8xf32> to vector<2x8x8xf32>
    "tpu.trace_start"() <{level = 10 : i32, message = "bqd,bkd->bqk"}> : () -> ()
    %cst_17 = arith.constant dense<0.000000e+00> : vector<2x8x8xf32>
    %80 = tpu.matmul %75, %77, %cst_17 {dimension_numbers = #tpu.dot_dimension_numbers<[2], [2], [1], [1], [0, 0, 0, 1, 1, 1], [0], [0]>} : vector<2x8x8xf32>, vector<2x8x8xf32>, vector<2x8x8xf32> -> vector<2x8x8xf32>
    "tpu.trace_stop"() : () -> ()
    %cst_18 = arith.constant dense<0xFF800000> : vector<2x8xf32>
    %81 = vector.multi_reduction <maximumf>, %80, %cst_18 [2] : vector<2x8x8xf32> to vector<2x8xf32>
    %82 = vector.shape_cast %81 : vector<2x8xf32> to vector<2x8x1xf32>
    %83 = vector.broadcast %82 : vector<2x8x1xf32> to vector<2x8x8xf32>
    %84 = arith.subf %80, %83 : vector<2x8x8xf32>
    %85 = math.exp %84 : vector<2x8x8xf32>
    %cst_19 = arith.constant dense<0.000000e+00> : vector<2x8xf32>
    %86 = vector.multi_reduction <add>, %85, %cst_19 [2] : vector<2x8x8xf32> to vector<2x8xf32>
    %87 = vector.shape_cast %86 : vector<2x8xf32> to vector<2x8x1xf32>
    %88 = tpu.reciprocal %87 {approx = true} : vector<2x8x1xf32> -> vector<2x8x1xf32>
    %89 = vector.broadcast %88 : vector<2x8x1xf32> to vector<2x8x8xf32>
    %90 = arith.mulf %85, %89 : vector<2x8x8xf32>
    "tpu.trace_start"() <{level = 10 : i32, message = "bqk,bkd->bqd"}> : () -> ()
    %cst_20 = arith.constant dense<0.000000e+00> : vector<2x8x8xf32>
    %91 = tpu.matmul %90, %79, %cst_20 {dimension_numbers = #tpu.dot_dimension_numbers<[2], [1], [1], [2], [0, 0, 0, 1, 1, 2], [0], [0]>} : vector<2x8x8xf32>, vector<2x8x8xf32>, vector<2x8x8xf32> -> vector<2x8x8xf32>
    "tpu.trace_stop"() : () -> ()
    %92 = vector.shape_cast %91 : vector<2x8x8xf32> to vector<16x8xf32>
    %93 = tpu.concatenate %35, %54, %73, %92 in 1 : vector<16x8xf32>, vector<16x8xf32>, vector<16x8xf32>, vector<16x8xf32> -> vector<16x32xf32>
    %c0_21 = arith.constant 0 : index
    %c0_22 = arith.constant 0 : index
    %94 = vector.load %arg2[%c0_21, %c0_22] : memref<32x32xf32, #tpu.memory_space<vmem>>, vector<32x32xf32>
    %cst_23 = arith.constant dense<0.000000e+00> : vector<16x32xf32>
    %95 = tpu.matmul %93, %94, %cst_23 {dimension_numbers = #tpu.dot_dimension_numbers<[1], [0], [0], [1], [0, 0, 1, 1], [], []>} : vector<16x32xf32>, vector<32x32xf32>, vector<16x32xf32> -> vector<16x32xf32>
    %96 = vector.broadcast %3 : vector<1x32xf32> to vector<16x32xf32>
    %97 = arith.addf %95, %96 : vector<16x32xf32>
    %98 = arith.addf %0, %97 : vector<16x32xf32>
    %cst_24 = arith.constant dense<0.000000e+00> : vector<16xf32>
    %99 = vector.multi_reduction <add>, %98, %cst_24 [1] : vector<16x32xf32> to vector<16xf32>
    %100 = vector.shape_cast %99 : vector<16xf32> to vector<16x1xf32>
    %cst_25 = arith.constant 3.200000e+01 : f32
    %101 = vector.broadcast %cst_25 : f32 to vector<16x1xf32>
    %102 = arith.divf %100, %101 : vector<16x1xf32>
    %103 = arith.mulf %98, %98 : vector<16x32xf32>
    %cst_26 = arith.constant dense<0.000000e+00> : vector<16xf32>
    %104 = vector.multi_reduction <add>, %103, %cst_26 [1] : vector<16x32xf32> to vector<16xf32>
    %105 = vector.shape_cast %104 : vector<16xf32> to vector<16x1xf32>
    %cst_27 = arith.constant 3.200000e+01 : f32
    %106 = vector.broadcast %cst_27 : f32 to vector<16x1xf32>
    %107 = arith.divf %105, %106 : vector<16x1xf32>
    %108 = vector.broadcast %102 : vector<16x1xf32> to vector<16x32xf32>
    %109 = arith.subf %98, %108 : vector<16x32xf32>
    %110 = arith.mulf %102, %102 : vector<16x1xf32>
    %111 = arith.subf %107, %110 : vector<16x1xf32>
    %cst_28 = arith.constant 9.99999974E-6 : f32
    %112 = vector.broadcast %cst_28 : f32 to vector<16x1xf32>
    %113 = arith.addf %111, %112 : vector<16x1xf32>
    %114 = math.rsqrt %113 : vector<16x1xf32>
    %115 = vector.broadcast %114 : vector<16x1xf32> to vector<16x32xf32>
    %116 = arith.mulf %109, %115 : vector<16x32xf32>
    %117 = vector.broadcast %4 : vector<1x32xf32> to vector<16x32xf32>
    %118 = arith.mulf %116, %117 : vector<16x32xf32>
    %119 = vector.broadcast %5 : vector<1x32xf32> to vector<16x32xf32>
    %120 = arith.addf %118, %119 : vector<16x32xf32>
    %c0_29 = arith.constant 0 : index
    %c0_30 = arith.constant 0 : index
    %121 = vector.load %arg3[%c0_29, %c0_30] : memref<32x64xf32, #tpu.memory_space<vmem>>, vector<32x64xf32>
    %cst_31 = arith.constant dense<0.000000e+00> : vector<16x64xf32>
    %122 = tpu.matmul %120, %121, %cst_31 {dimension_numbers = #tpu.dot_dimension_numbers<[1], [0], [0], [1], [0, 0, 1, 1], [], []>} : vector<16x32xf32>, vector<32x64xf32>, vector<16x64xf32> -> vector<16x64xf32>
    %123 = vector.broadcast %6 : vector<1x64xf32> to vector<16x64xf32>
    %124 = arith.addf %122, %123 : vector<16x64xf32>
    %cst_32 = arith.constant 0.000000e+00 : f32
    %125 = vector.broadcast %cst_32 : f32 to vector<16x64xf32>
    %126 = arith.maximumf %124, %125 : vector<16x64xf32>
    %c0_33 = arith.constant 0 : index
    %c0_34 = arith.constant 0 : index
    %127 = vector.load %arg4[%c0_33, %c0_34] : memref<64x32xf32, #tpu.memory_space<vmem>>, vector<64x32xf32>
    %cst_35 = arith.constant dense<0.000000e+00> : vector<16x32xf32>
    %128 = tpu.matmul %126, %127, %cst_35 {dimension_numbers = #tpu.dot_dimension_numbers<[1], [0], [0], [1], [0, 0, 1, 1], [], []>} : vector<16x64xf32>, vector<64x32xf32>, vector<16x32xf32> -> vector<16x32xf32>
    %129 = vector.broadcast %7 : vector<1x32xf32> to vector<16x32xf32>
    %130 = arith.addf %128, %129 : vector<16x32xf32>
    %131 = arith.addf %120, %130 : vector<16x32xf32>
    %cst_36 = arith.constant dense<0.000000e+00> : vector<16xf32>
    %132 = vector.multi_reduction <add>, %131, %cst_36 [1] : vector<16x32xf32> to vector<16xf32>
    %133 = vector.shape_cast %132 : vector<16xf32> to vector<16x1xf32>
    %cst_37 = arith.constant 3.200000e+01 : f32
    %134 = vector.broadcast %cst_37 : f32 to vector<16x1xf32>
    %135 = arith.divf %133, %134 : vector<16x1xf32>
    %136 = arith.mulf %131, %131 : vector<16x32xf32>
    %cst_38 = arith.constant dense<0.000000e+00> : vector<16xf32>
    %137 = vector.multi_reduction <add>, %136, %cst_38 [1] : vector<16x32xf32> to vector<16xf32>
    %138 = vector.shape_cast %137 : vector<16xf32> to vector<16x1xf32>
    %cst_39 = arith.constant 3.200000e+01 : f32
    %139 = vector.broadcast %cst_39 : f32 to vector<16x1xf32>
    %140 = arith.divf %138, %139 : vector<16x1xf32>
    %141 = vector.broadcast %135 : vector<16x1xf32> to vector<16x32xf32>
    %142 = arith.subf %131, %141 : vector<16x32xf32>
    %143 = arith.mulf %135, %135 : vector<16x1xf32>
    %144 = arith.subf %140, %143 : vector<16x1xf32>
    %cst_40 = arith.constant 9.99999974E-6 : f32
    %145 = vector.broadcast %cst_40 : f32 to vector<16x1xf32>
    %146 = arith.addf %144, %145 : vector<16x1xf32>
    %147 = math.rsqrt %146 : vector<16x1xf32>
    %148 = vector.broadcast %147 : vector<16x1xf32> to vector<16x32xf32>
    %149 = arith.mulf %142, %148 : vector<16x32xf32>
    %150 = vector.broadcast %8 : vector<1x32xf32> to vector<16x32xf32>
    %151 = arith.mulf %149, %150 : vector<16x32xf32>
    %152 = vector.broadcast %9 : vector<1x32xf32> to vector<16x32xf32>
    %153 = arith.addf %151, %152 : vector<16x32xf32>
    %c0_41 = arith.constant 0 : index
    %c0_42 = arith.constant 0 : index
    %154 = vector.load %arg6[%c0_41, %c0_42] : memref<16x32xf32, #tpu.memory_space<vmem>>, vector<16x32xf32>
    tpu.vector_store %arg6[%c0_41, %c0_42], %153 {strides = array<i32>} : memref<16x32xf32, #tpu.memory_space<vmem>>, vector<16x32xf32>,
    return
  }
}

</mosaic_0001>

<bundles_post_ra>
// kernel: tpu_custom_call.1
= control target key start
LH: loop header
LB: loop body
LE: loop exit
PB: predicated region body
PF: predicated region fallthrough
CT: control target
= control target key end

     0   :  { %11 = vsyncpa [#allocation3], 0  ;;  %s2502_s0 = inlined_call_operand.hbm [shape: f32[16,32], index: 0, kind: input, shape index: {}]   ;;  %s2503_s1 = inlined_call_operand.vmem [shape: f32[32,96], index: 1, kind: input, shape index: {}]   ;;  %s2504_s2 = inlined_call_operand.vmem [shape: f32[32,32], index: 2, kind: input, shape index: {}]   ;;  %s2505_s3 = inlined_call_operand.vmem [shape: f32[32,64], index: 3, kind: input, shape index: {}]   ;;  %s2506_s4 = inlined_call_operand.vmem [shape: f32[64,32], index: 4, kind: input, shape index: {}]   ;;  %s2507_s5 = inlined_call_operand.vmem [shape: f32[8,128], index: 5, kind: input, shape index: {}]   ;;  %s2508_s6 = inlined_call_operand.hbm [shape: f32[16,32], index: 6, kind: output, shape index: {}]  }
   0x1   :  { %12 = vsyncpa [#allocation4], 0  ;;  %s2191_s21 = smov [#allocation2]  }
   0x2   :  { %s18_s22 = sshll.u32 %s2191_s21, 4  ;;  %s19_s22 = int_to_ptr.vmem [resolvable:$true] %s18_s22 }
   0x3   :  { %s2155_s23 = scalar_lea.vmem %s19_s22, 256  ;;  %p2160_p1 = scmp.lt.s32.totalorder %s19_s22, %s19_s22 }
   0x4   :  { %p2156_p0 = scmp.ne.s32.totalorder %s19_s22, %s2155_s23  ;;  %p2161_p2 = scmp.lt.s32.totalorder %s2155_s23, %s2155_s23 }
   0x6   :  { %p2162_p3 = por %p2161_p2, %p2160_p1 }
   0x8   :  { %p2163_p4 = pnand %p2162_p3, %p2156_p0 }
   0xa   :  { %2166 = shalt.err (!%p2163_p4)
}
   0xb   :  { %s2192_s24 = smov 128   ;;  %s2193_s25 = smov 8  }
   0xc   :  { %24 = dma.hbm_to_vmem [thread:$0]  %s2502_s0, 256, %s19_s22, [#allocation3], %s2192_s24, %s2192_s24, %s2193_s25  }
   0xd   :  { %2187 = dma.done.wait [#allocation3], 256  }
   0xe   :  { %2188 = vsyncadd [#allocation3], 4294967040  ;;  %vm49_vm0 = vcmask 261120   ;;  %v44_v0 = vld [vmem:[%s2503_s1 + $0x18] sm:$0xff]  ;;  %v43_v1 = vld [vmem:[%s2503_s1 + $0x10] sm:$0xff]  ;;  %v2194_v6 = vmov 0.0   ;;  %v45_v7 = vlaneseq }
   0xf   :  { %1956 = vmatprep.subr.mxu1 %v44_v0  ;;  %v2257_v2 = vld [vmem:[#allocation2] sm:$0xff]  ;;  %v42_v3 = vld [vmem:[%s2503_s1 + $0x8] sm:$0xff]  ;;  %1977 = vmatprep.subr.mxu0 %v2194_v6  ;;  %vm2195_vm1 = vmmov 0   ;;  %s2196_s12 = smov 96   ;;  %vm134_vm2 = vcmask 64512   ;;  %s2198_s13 = smov 88  }
  0x10   :  { %1957 = vmatpush3.msra.mxu1 %v44_v0  ;;  %1964 = vmatprep.mubr.msk.f32.mxu1 %vm49_vm0, %v2257_v2  ;;  %v41_v4 = vld [vmem:[%s2503_s1] sm:$0xff]  ;;  %v2267_v5 = vld [vmem:[#allocation2 + $0x8] sm:$0xff]  ;;  %v2273_v8 = vshrl.u32 %v45_v7, 7  ;;  %s2199_s14 = smov 120   ;;  %s2200_s15 = smov 56   ;;  %vm1479_vm3 = vcmask 195584  }
  0x11   :  { %1958 = vmatprep.subr.mxu1 %v43_v1  ;;  %1979 = vmatprep.mubr.msk.f32.mxu0 %vm2195_vm1, %v2194_v6  ;;  %v2283_v10 = vld [vmem:[%s2507_s5] sm:$0xff]  ;;  %s2197_s5 = smov 64   ;;  %s2201_s16 = smov 80   ;;  %vm1476_vm4 = vcmask 130048   ;;  %vm1719_vm5 = vcmask 523264  }
  0x12   :  { %1959 = vmatpush3.msra.mxu1 %v43_v1  ;;  %v47_v9 = vsub.s32 0, %v2273_v8  ;;  %s2202_s17 = smov 112   ;;  %s2203_s18 = smov 48  }
  0x13   :  { %1960 = vmatprep.subr.mxu1 %v42_v3  ;;  %s2204_s19 = smov 72   ;;  %s2205_s20 = smov 104  }
  0x14   :  { %1961 = vmatpush3.msra.mxu1 %v42_v3  ;;  %v48_v12 = vrot.slane %v2283_v10, %v47_v9  ;;  %s2206_s21 = smov 40   ;;  %s2207_s22 = smov 16  }
  0x15   :  { %1962 = vmatprep.subr.mxu1 %v41_v4  ;;  %s2208_s9 = smov 24  }
  0x16   :  { %1963 = vmatpush3.msra.mxu1 %v41_v4 }
  0x17   :  { %1965 = vmatmul.mubr.msk.f32.vlgmr.msra.gmra.mxu1 %vm49_vm0, %v2267_v5  ;;  %1967 = vmatprep.subr.mxu1 %v2194_v6 }
  0x18   :  { %1969 = vmatprep.mubr.msk.f32.mxu1 %vm2195_vm1, %v2194_v6 }
  0xd7   :  { %v1966_v11 = vpop.f32.mrf.mxu1 }
  0xd8   :  { %v2289_v15 = vadd.f32 %v1966_v11, %v48_v12 }
  0xd9   :  { %v122_v13 = vpop.f32.mrf.mxu1 }
  0xda   :  { %v2286_v14 = vadd.f32 %v122_v13, %v48_v12 }
  0xdc   :  { %132 = vrot.lane.b32.xlu0 %v2286_v14, %s2196_s12 }
  0xe0   :  { %210 = vrot.lane.b32.xlu0 %v2289_v15, %s2196_s12 }
 0x14e   :  { %v133_v16 = vpop.permute.xlu0 %132 }
 0x14f   :  { %1968 = vmatpush3.xpose.msk.msra.mxu1 %vm134_vm2, %v133_v16 }
 0x150   :  { %1972 = vmatprep.subr.mxu1 %v2194_v6 }
 0x152   :  { %1970 = vmatmul.mubr.msk.f32.vlgmr.msra.gmra.mxu1 %vm134_vm2, %v2286_v14  ;;  %v211_v17 = vpop.permute.xlu0 %210 }
 0x153   :  { %1973 = vmatpush3.xpose.msk.msra.mxu1 %vm134_vm2, %v211_v17  ;;  %1974 = vmatprep.mubr.msk.f32.mxu1 %vm2195_vm1, %v2194_v6 }
 0x154   :  { %1982 = vmatprep.subr.mxu1 %v2194_v6 }
 0x156   :  { %1975 = vmatmul.mubr.msk.f32.vlgmr.msra.gmra.mxu1 %vm134_vm2, %v2289_v15 }
 0x157   :  { %1984 = vmatprep.mubr.msk.f32.mxu1 %vm2195_vm1, %v2194_v6 }
 0x212   :  { %v205_v18 = vpop.f32.mrf.mxu1 }
 0x213   :  { %v286_v19 = vsel %vm134_vm2, %v205_v18, -inf }
 0x214   :  { %287 = vmax.xlane.f32.xlu1 %v286_v19  ;;  %v1971_v20 = vpop.f32.mrf.mxu1 }
 0x216   :  { %v282_v21 = vpop.f32.mrf.mxu1 }
 0x217   :  { %v289_v22 = vsel %vm134_vm2, %v282_v21, -inf }
 0x218   :  { %290 = vmax.xlane.f32.xlu1 %v289_v22  ;;  %v1976_v23 = vpop.f32.mrf.mxu1 }
 0x229   :  { %308 = vrot.lane.b32.xlu1 %v2286_v14, %s2197_s5 }
 0x22d   :  { %384 = vrot.lane.b32.xlu1 %v2289_v15, %s2197_s5 }
 0x231   :  { %462 = vrot.lane.b32.xlu1 %v2286_v14, %s2198_s13 }
 0x235   :  { %540 = vrot.lane.b32.xlu1 %v2289_v15, %s2198_s13 }
 0x29d   :  { %v288_v24 = vpop.xlane.xlu1 %287 }
 0x29e   :  { %v292_v25 = vsub.f32 %v205_v18, %v288_v24 }
 0x2a0   :  { %v294_v26 = vmul.f32 1.442695, %v292_v25 }
 0x2a1   :  { %v291_v27 = vpop.xlane.xlu1 %290 }
 0x2a2   :  { %2107 = vpow2.f32 %v294_v26  ;;  %v293_v28 = vsub.f32 %v282_v21, %v291_v27 }
 0x2a4   :  { %v296_v29 = vmul.f32 1.442695, %v293_v28 }
 0x2a5   :  { %v309_v30 = vpop.permute.xlu1 %308 }
 0x2a6   :  { %2109 = vpow2.f32 %v296_v29  ;;  %1978 = vmatpush3.msra.mxu0 %v309_v30 }
 0x2a7   :  { %1987 = vmatprep.subr.mxu0 %v2194_v6 }
 0x2a9   :  { %v385_v31 = vpop.permute.xlu1 %384 }
 0x2aa   :  { %1983 = vmatpush3.msra.mxu1 %v385_v31 }
 0x2ab   :  { %1992 = vmatprep.subr.mxu1 %v2194_v6 }
 0x2ad   :  { %v463_v36 = vpop.permute.xlu1 %462 }
 0x2af   :  { %v2108_v32 = vpop.eup %2107 }
 0x2b0   :  { %v298_v33 = vsel %vm134_vm2, %v2108_v32, 0.0 }
 0x2b1   :  { %299 = vadd.xlane.f32.xlu0 %v298_v33  ;;  %v541_v37 = vpop.permute.xlu1 %540 }
 0x2b3   :  { %v2110_v34 = vpop.eup %2109 }
 0x2b4   :  { %v301_v35 = vsel %vm134_vm2, %v2110_v34, 0.0 }
 0x2b5   :  { %302 = vadd.xlane.f32.xlu1 %v301_v35 }
 0x2c6   :  { %538 = vrot.lane.b32.xlu1 %v2289_v15, %s2199_s14 }
 0x2c7   :  { %460 = vrot.lane.b32.xlu0 %v2286_v14, %s2199_s14 }
 0x33a   :  { %v300_v38 = vpop.xlane.xlu0 %299 }
 0x33b   :  { %2111 = vrcp.f32 %v300_v38 }
 0x33e   :  { %v303_v39 = vpop.xlane.xlu1 %302  ;;  %v461_v44 = vpop.permute.xlu0 %460 }
 0x33f   :  { %2113 = vrcp.f32 %v303_v39 }
 0x342   :  { %v539_v45 = vpop.permute.xlu1 %538 }
 0x348   :  { %v2112_v40 = vpop.eup %2111 }
 0x349   :  { %v306_v41 = vmul.f32 %v2112_v40, %v2108_v32 }
 0x34b   :  { %1980 = vmatmul.mubr.msk.f32.vlgmr.msra.gmra.mxu0 %vm134_vm2, %v306_v41 }
 0x34c   :  { %v2114_v42 = vpop.eup %2113  ;;  %1988 = vmatpush3.xpose.msk.msra.mxu0 %vm134_vm2, %v463_v36  ;;  %1989 = vmatprep.mubr.msk.f32.mxu0 %vm2195_vm1, %v2194_v6 }
 0x34d   :  { %v307_v43 = vmul.f32 %v2114_v42, %v2110_v34  ;;  %1997 = vmatprep.subr.mxu0 %v2194_v6 }
 0x34f   :  { %1985 = vmatmul.mubr.msk.f32.vlgmr.msra.gmra.mxu1 %vm134_vm2, %v307_v43  ;;  %1990 = vmatmul.mubr.msk.f32.vlgmr.msra.gmra.mxu0 %vm134_vm2, %v461_v44 }
 0x350   :  { %1993 = vmatpush3.xpose.msk.msra.mxu1 %vm134_vm2, %v541_v37  ;;  %1994 = vmatprep.mubr.msk.f32.mxu1 %vm2195_vm1, %v2194_v6 }
 0x351   :  { %2002 = vmatprep.subr.mxu1 %v2194_v6  ;;  %1999 = vmatprep.mubr.msk.f32.mxu0 %vm2195_vm1, %v2194_v6 }
 0x353   :  { %1995 = vmatmul.mubr.msk.f32.vlgmr.msra.gmra.mxu1 %vm134_vm2, %v539_v45 }
 0x354   :  { %2004 = vmatprep.mubr.msk.f32.mxu1 %vm2195_vm1, %v2194_v6 }
 0x40b   :  { %v2332_v46 = vpop.f32.mrf.mxu0 }
 0x40d   :  { %v1981_v47 = vpop.f32.mrf.mxu0 }
 0x40f   :  { %v2334_v48 = vpop.f32.mrf.mxu1  ;;  %v534_v49 = vpop.f32.mrf.mxu0 }
 0x410   :  { %v616_v50 = vsel %vm134_vm2, %v534_v49, -inf }
 0x411   :  { %v1986_v51 = vpop.f32.mrf.mxu1  ;;  %617 = vmax.xlane.f32.xlu1 %v616_v50  ;;  %v1991_v52 = vpop.f32.mrf.mxu0 }
 0x413   :  { %v612_v53 = vpop.f32.mrf.mxu1 }
 0x414   :  { %v619_v54 = vsel %vm134_vm2, %v612_v53, -inf }
 0x415   :  { %620 = vmax.xlane.f32.xlu0 %v619_v54  ;;  %v1996_v55 = vpop.f32.mrf.mxu1 }
 0x422   :  { %638 = vrot.lane.b32.xlu1 %v2286_v14, %s2200_s15 }
 0x426   :  { %792 = vrot.lane.b32.xlu1 %v2286_v14, %s2201_s16 }
 0x42a   :  { %870 = vrot.lane.b32.xlu1 %v2289_v15, %s2201_s16 }
 0x42b   :  { %714 = vrot.lane.b32.xlu0 %v2289_v15, %s2200_s15 }
 0x42f   :  { %790 = vrot.lane.b32.xlu0 %v2286_v14, %s2202_s17 }
 0x49a   :  { %v618_v56 = vpop.xlane.xlu1 %617 }
 0x49b   :  { %v622_v57 = vsub.f32 %v534_v49, %v618_v56 }
 0x49d   :  { %v624_v58 = vmul.f32 1.442695, %v622_v57 }
 0x49e   :  { %v639_v59 = vpop.permute.xlu1 %638  ;;  %v621_v60 = vpop.xlane.xlu0 %620 }
 0x49f   :  { %2115 = vpow2.f32 %v624_v58  ;;  %v623_v61 = vsub.f32 %v612_v53, %v621_v60  ;;  %1998 = vmatpush3.msra.mxu0 %v639_v59 }
 0x4a0   :  { %2007 = vmatprep.subr.mxu0 %v2194_v6 }
 0x4a1   :  { %v626_v62 = vmul.f32 1.442695, %v623_v61 }
 0x4a2   :  { %v715_v63 = vpop.permute.xlu0 %714  ;;  %v793_v7 = vpop.permute.xlu1 %792 }
 0x4a3   :  { %2117 = vpow2.f32 %v626_v62  ;;  %2003 = vmatpush3.msra.mxu1 %v715_v63 }
 0x4a4   :  { %2012 = vmatprep.subr.mxu1 %v2194_v6 }
 0x4a6   :  { %v871_v9 = vpop.permute.xlu1 %870  ;;  %v791_v19 = vpop.permute.xlu0 %790 }
 0x4ac   :  { %v2116_v0 = vpop.eup %2115 }
 0x4ad   :  { %v628_v1 = vsel %vm134_vm2, %v2116_v0, 0.0 }
 0x4ae   :  { %629 = vadd.xlane.f32.xlu1 %v628_v1 }
 0x4b0   :  { %v2118_v3 = vpop.eup %2117 }
 0x4b1   :  { %v631_v4 = vsel %vm134_vm2, %v2118_v3, 0.0 }
 0x4b2   :  { %632 = vadd.xlane.f32.xlu1 %v631_v4 }
 0x4c3   :  { %868 = vrot.lane.b32.xlu1 %v2289_v15, %s2202_s17 }
 0x537   :  { %v630_v11 = vpop.xlane.xlu1 %629 }
 0x538   :  { %2119 = vrcp.f32 %v630_v11 }
 0x53b   :  { %v633_v12 = vpop.xlane.xlu1 %632 }
 0x53c   :  { %2121 = vrcp.f32 %v633_v12 }
 0x53f   :  { %v869_v20 = vpop.permute.xlu1 %868 }
 0x545   :  { %v2120_v13 = vpop.eup %2119 }
 0x546   :  { %v636_v16 = vmul.f32 %v2120_v13, %v2116_v0 }
 0x548   :  { %2000 = vmatmul.mubr.msk.f32.vlgmr.msra.gmra.mxu0 %vm134_vm2, %v636_v16 }
 0x549   :  { %v2122_v17 = vpop.eup %2121  ;;  %2008 = vmatpush3.xpose.msk.msra.mxu0 %vm134_vm2, %v793_v7  ;;  %2009 = vmatprep.mubr.msk.f32.mxu0 %vm2195_vm1, %v2194_v6 }
 0x54a   :  { %v637_v18 = vmul.f32 %v2122_v17, %v2118_v3  ;;  %2017 = vmatprep.subr.mxu0 %v2194_v6 }
 0x54c   :  { %2005 = vmatmul.mubr.msk.f32.vlgmr.msra.gmra.mxu1 %vm134_vm2, %v637_v18  ;;  %2010 = vmatmul.mubr.msk.f32.vlgmr.msra.gmra.mxu0 %vm134_vm2, %v791_v19 }
 0x54d   :  { %2013 = vmatpush3.xpose.msk.msra.mxu1 %vm134_vm2, %v871_v9  ;;  %2014 = vmatprep.mubr.msk.f32.mxu1 %vm2195_vm1, %v2194_v6 }
 0x54e   :  { %2022 = vmatprep.subr.mxu1 %v2194_v6  ;;  %2019 = vmatprep.mubr.msk.f32.mxu0 %vm2195_vm1, %v2194_v6 }
 0x550   :  { %2015 = vmatmul.mubr.msk.f32.vlgmr.msra.gmra.mxu1 %vm134_vm2, %v869_v20 }
 0x551   :  { %2024 = vmatprep.mubr.msk.f32.mxu1 %vm2195_vm1, %v2194_v6 }
 0x608   :  { %v2364_v21 = vpop.f32.mrf.mxu0 }
 0x60a   :  { %v2001_v22 = vpop.f32.mrf.mxu0 }
 0x60c   :  { %v2366_v23 = vpop.f32.mrf.mxu1  ;;  %v864_v24 = vpop.f32.mrf.mxu0 }
 0x60d   :  { %v946_v25 = vsel %vm134_vm2, %v864_v24, -inf }
 0x60e   :  { %v2006_v26 = vpop.f32.mrf.mxu1  ;;  %947 = vmax.xlane.f32.xlu0 %v946_v25  ;;  %v2011_v27 = vpop.f32.mrf.mxu0  ;;  %v1483_v25 = vld [vmem:[%s2504_s2 + $0x8] sm:$0xff] }
 0x60f   :  { %v1482_v26 = vld [vmem:[%s2504_s2] sm:$0xff] }
 0x610   :  { %v942_v28 = vpop.f32.mrf.mxu1 }
 0x611   :  { %v949_v29 = vsel %vm134_vm2, %v942_v28, -inf }
 0x612   :  { %950 = vmax.xlane.f32.xlu1 %v949_v29  ;;  %v2016_v30 = vpop.f32.mrf.mxu1 }
 0x623   :  { %968 = vrot.lane.b32.xlu1 %v2286_v14, %s2203_s18 }
 0x624   :  { %1044 = vrot.lane.b32.xlu0 %v2289_v15, %s2203_s18 }
 0x627   :  { %1122 = vrot.lane.b32.xlu1 %v2286_v14, %s2204_s19 }
 0x62b   :  { %1200 = vrot.lane.b32.xlu1 %v2289_v15, %s2204_s19 }
 0x62f   :  { %1198 = vrot.lane.b32.xlu1 %v2289_v15, %s2205_s20 }
 0x697   :  { %v948_v31 = vpop.xlane.xlu0 %947 }
 0x698   :  { %v952_v32 = vsub.f32 %v864_v24, %v948_v31  ;;  %v1485_v24 = vld [vmem:[%s2504_s2 + $0x18] sm:$0xff] }
 0x69a   :  { %v954_v33 = vmul.f32 1.442695, %v952_v32 }
 0x69b   :  { %v951_v34 = vpop.xlane.xlu1 %950  ;;  %v1045_v35 = vpop.permute.xlu0 %1044 }
 0x69c   :  { %2123 = vpow2.f32 %v954_v33  ;;  %v953_v36 = vsub.f32 %v942_v28, %v951_v34  ;;  %2023 = vmatpush3.msra.mxu1 %v1045_v35 }
 0x69d   :  { %2032 = vmatprep.subr.mxu1 %v2194_v6 }
 0x69e   :  { %v956_v37 = vmul.f32 1.442695, %v953_v36 }
 0x69f   :  { %v969_v38 = vpop.permute.xlu1 %968 }
 0x6a0   :  { %2125 = vpow2.f32 %v956_v37  ;;  %2018 = vmatpush3.msra.mxu0 %v969_v38 }
 0x6a1   :  { %2027 = vmatprep.subr.mxu0 %v2194_v6 }
 0x6a3   :  { %v1123_v45 = vpop.permute.xlu1 %1122 }
 0x6a7   :  { %v1201_v51 = vpop.permute.xlu1 %1200 }
 0x6a9   :  { %v2124_v39 = vpop.eup %2123 }
 0x6aa   :  { %v958_v40 = vsel %vm134_vm2, %v2124_v39, 0.0 }
 0x6ab   :  { %959 = vadd.xlane.f32.xlu0 %v958_v40  ;;  %v1199_v54 = vpop.permute.xlu1 %1198 }
 0x6ad   :  { %v2126_v41 = vpop.eup %2125 }
 0x6ae   :  { %v961_v42 = vsel %vm134_vm2, %v2126_v41, 0.0 }
 0x6af   :  { %962 = vadd.xlane.f32.xlu0 %v961_v42 }
 0x6c5   :  { %1120 = vrot.lane.b32.xlu0 %v2286_v14, %s2205_s20 }
 0x734   :  { %v960_v43 = vpop.xlane.xlu0 %959 }
 0x735   :  { %2127 = vrcp.f32 %v960_v43  ;;  %v1488_v43 = vsub.s32 1, %v2273_v8 }
 0x738   :  { %v963_v44 = vpop.xlane.xlu0 %962 }
 0x739   :  { %2129 = vrcp.f32 %v963_v44  ;;  %v1489_v44 = vrot.slane %v2283_v10, %v1488_v43  ;;  %v1717_v43 = vsub.s32 5, %v2273_v8 }
 0x73c   :  { %v1121_v53 = vpop.permute.xlu0 %1120 }
 0x742   :  { %v2128_v47 = vpop.eup %2127 }
 0x743   :  { %v966_v49 = vmul.f32 %v2128_v47, %v2124_v39 }
 0x745   :  { %2020 = vmatmul.mubr.msk.f32.vlgmr.msra.gmra.mxu0 %vm134_vm2, %v966_v49 }
 0x746   :  { %v2130_v50 = vpop.eup %2129  ;;  %2028 = vmatpush3.xpose.msk.msra.mxu0 %vm134_vm2, %v1123_v45  ;;  %2029 = vmatprep.mubr.msk.f32.mxu0 %vm2195_vm1, %v2194_v6 }
 0x747   :  { %v967_v52 = vmul.f32 %v2130_v50, %v2126_v41  ;;  %2037 = vmatprep.subr.mxu0 %v2194_v6 }
 0x749   :  { %2025 = vmatmul.mubr.msk.f32.vlgmr.msra.gmra.mxu1 %vm134_vm2, %v967_v52  ;;  %2030 = vmatmul.mubr.msk.f32.vlgmr.msra.gmra.mxu0 %vm134_vm2, %v1121_v53 }
 0x74a   :  { %2033 = vmatpush3.xpose.msk.msra.mxu1 %vm134_vm2, %v1201_v51  ;;  %2034 = vmatprep.mubr.msk.f32.mxu1 %vm2195_vm1, %v2194_v6 }
 0x74b   :  { %2042 = vmatprep.subr.mxu1 %v2194_v6  ;;  %2039 = vmatprep.mubr.msk.f32.mxu0 %vm2195_vm1, %v2194_v6 }
 0x74d   :  { %2035 = vmatmul.mubr.msk.f32.vlgmr.msra.gmra.mxu1 %vm134_vm2, %v1199_v54 }
 0x74e   :  { %2044 = vmatprep.mubr.msk.f32.mxu1 %vm2195_vm1, %v2194_v6 }
 0x805   :  { %v1040_v55 = vpop.f32.mrf.mxu0 }
 0x807   :  { %v2021_v56 = vpop.f32.mrf.mxu0 }
 0x808   :  { %v1618_v56 = vld [vmem:[%s2505_s3 + $0x10] sm:$0xff] }
 0x809   :  { %v1116_v57 = vpop.f32.mrf.mxu1  ;;  %v1194_v58 = vpop.f32.mrf.mxu0 }
 0x80a   :  { %v1276_v59 = vsel %vm134_vm2, %v1194_v58, -inf }
 0x80b   :  { %v2026_v60 = vpop.f32.mrf.mxu1  ;;  %1277 = vmax.xlane.f32.xlu0 %v1276_v59  ;;  %v2031_v61 = vpop.f32.mrf.mxu0  ;;  %v1714_v59 = vld [vmem:[%s2506_s4 + $0x38] sm:$0xff] }
 0x80c   :  { %v1713_v60 = vld [vmem:[%s2506_s4 + $0x30] sm:$0xff]  ;;  %v1712_v61 = vld [vmem:[%s2506_s4 + $0x28] sm:$0xff] }
 0x80d   :  { %v1272_v62 = vpop.f32.mrf.mxu1 }
 0x80e   :  { %v1279_v63 = vsel %vm134_vm2, %v1272_v62, -inf }
 0x80f   :  { %1280 = vmax.xlane.f32.xlu1 %v1279_v63  ;;  %v2036_v0 = vpop.f32.mrf.mxu1 }
 0x820   :  { %1298 = vrot.lane.b32.xlu1 %v2286_v14, %s2206_s21 }
 0x824   :  { %1452 = vrot.lane.b32.xlu1 %v2364_v21, %s2193_s25 }
 0x828   :  { %1454 = vrot.lane.b32.xlu1 %v2366_v23, %s2193_s25 }
 0x82c   :  { %1462 = vrot.lane.b32.xlu1 %v1116_v57, %s2207_s22  ;;  %v1617_v57 = vld [vmem:[%s2505_s3 + $0x8] sm:$0xff] }
 0x894   :  { %v1278_v6 = vpop.xlane.xlu0 %1277 }
 0x895   :  { %v1282_v1 = vsub.f32 %v1194_v58, %v1278_v6  ;;  %v1616_v58 = vld [vmem:[%s2505_s3] sm:$0xff] }
 0x897   :  { %v1284_v3 = vmul.f32 1.442695, %v1282_v1 }
 0x898   :  { %v1281_v4 = vpop.xlane.xlu1 %1280 }
 0x899   :  { %2131 = vpow2.f32 %v1284_v3  ;;  %v1283_v7 = vsub.f32 %v1272_v62, %v1281_v4  ;;  %v1711_v62 = vld [vmem:[%s2506_s4 + $0x20] sm:$0xff] }
 0x89b   :  { %v1286_v9 = vmul.f32 1.442695, %v1283_v7 }
 0x89c   :  { %v1299_v11 = vpop.permute.xlu1 %1298 }
 0x89d   :  { %2133 = vpow2.f32 %v1286_v9  ;;  %2038 = vmatpush3.msra.mxu0 %v1299_v11 }
 0x89e   :  { %2047 = vmatprep.subr.mxu0 %v1485_v24 }
 0x8a0   :  { %v1453_v31 = vpop.permute.xlu1 %1452 }
 0x8a1   :  { %v1474_v34 = vsel %vm134_vm2, %v2332_v46, %v1453_v31  ;;  %v1710_v31 = vld [vmem:[%s2506_s4 + $0x18] sm:$0xff] }
 0x8a4   :  { %v1455_v32 = vpop.permute.xlu1 %1454 }
 0x8a5   :  { %v1475_v39 = vsel %vm134_vm2, %v2334_v48, %v1455_v32  ;;  %v1709_v32 = vld [vmem:[%s2506_s4 + $0x10] sm:$0xff] }
 0x8a6   :  { %v2132_v12 = vpop.eup %2131 }
 0x8a7   :  { %v1288_v14 = vsel %vm134_vm2, %v2132_v12, 0.0 }
 0x8a8   :  { %1289 = vadd.xlane.f32.xlu0 %v1288_v14  ;;  %v1463_v35 = vpop.permute.xlu1 %1462 }
 0x8a9   :  { %v1478_v40 = vsel %vm1476_vm4, %v1475_v39, %v1463_v35  ;;  %v1622_v35 = vsub.s32 4, %v2273_v8 }
 0x8aa   :  { %v2134_v13 = vpop.eup %2133 }
 0x8ab   :  { %v1291_v16 = vsel %vm134_vm2, %v2134_v13, 0.0 }
 0x8ac   :  { %1292 = vadd.xlane.f32.xlu0 %v1291_v16 }
 0x8c2   :  { %1374 = vrot.lane.b32.xlu0 %v2289_v15, %s2206_s21  ;;  %v1484_v15 = vld [vmem:[%s2504_s2 + $0x10] sm:$0xff] }
 0x8c6   :  { %1460 = vrot.lane.b32.xlu0 %v1040_v55, %s2207_s22 }
 0x931   :  { %v1290_v17 = vpop.xlane.xlu0 %1289 }
 0x932   :  { %2135 = vrcp.f32 %v1290_v17 }
 0x935   :  { %v1293_v18 = vpop.xlane.xlu0 %1292 }
 0x936   :  { %2137 = vrcp.f32 %v1293_v18  ;;  %v1606_v18 = vsub.s32 2, %v2273_v8 }
 0x939   :  { %v1375_v19 = vpop.permute.xlu0 %1374 }
 0x93a   :  { %2043 = vmatpush3.msra.mxu1 %v1375_v19  ;;  %v1612_v19 = vsub.s32 3, %v2273_v8 }
 0x93d   :  { %v1461_v33 = vpop.permute.xlu0 %1460 }
 0x93e   :  { %v1477_v36 = vsel %vm1476_vm4, %v1474_v34, %v1461_v33  ;;  %v1708_v33 = vld [vmem:[%s2506_s4 + $0x8] sm:$0xff]  ;;  %v1707_v34 = vld [vmem:[%s2506_s4] sm:$0xff]  ;;  %s2209_s4 = smov [#allocation5]  }
 0x93f   :  { %v2136_v20 = vpop.eup %2135  ;;  %s1852_s7 = sshll.u32 %s2209_s4, 4  ;;  %s1853_s7 = int_to_ptr.vmem [resolvable:$true] %s1852_s7 }
 0x940   :  { %v1296_v21 = vmul.f32 %v2136_v20, %v2132_v12  ;;  %s2167_s8 = scalar_lea.vmem %s1853_s7, 256  ;;  %p2172_p6 = scmp.lt.s32.totalorder %s1853_s7, %s1853_s7 }
 0x941   :  { %p2168_p5 = scmp.ne.s32.totalorder %s1853_s7, %s2167_s8  ;;  %p2173_p7 = scmp.lt.s32.totalorder %s2167_s8, %s2167_s8 }
 0x942   :  { %2040 = vmatmul.mubr.msk.f32.vlgmr.msra.gmra.mxu0 %vm134_vm2, %v1296_v21  ;;  %v1607_v21 = vrot.slane %v2283_v10, %v1606_v18 }
 0x943   :  { %v2138_v22 = vpop.eup %2137  ;;  %2048 = vmatpush3.msra.mxu0 %v1485_v24  ;;  %v1613_v24 = vrot.slane %v2283_v10, %v1612_v19  ;;  %p2174_p8 = por %p2173_p7, %p2172_p6 }
 0x944   :  { %v1297_v23 = vmul.f32 %v2138_v22, %v2134_v13  ;;  %2049 = vmatprep.subr.mxu0 %v1484_v15 }
 0x945   :  { %2050 = vmatpush3.msra.mxu0 %v1484_v15  ;;  %p2175_p9 = pnand %p2174_p8, %p2168_p5 }
 0x946   :  { %2045 = vmatmul.mubr.msk.f32.vlgmr.msra.gmra.mxu1 %vm134_vm2, %v1297_v23  ;;  %2051 = vmatprep.subr.mxu0 %v1483_v25 }
 0x947   :  { %2052 = vmatpush3.msra.mxu0 %v1483_v25 }
 0x948   :  { %2053 = vmatprep.subr.mxu0 %v1482_v26 }
 0x949   :  { %2054 = vmatpush3.msra.mxu0 %v1482_v26 }
 0x94a   :  { %2069 = vmatprep.subr.mxu0 %v1714_v59 }
 0xa02   :  { %v1370_v27 = vpop.f32.mrf.mxu0 }
 0xa03   :  { %1468 = vrot.lane.b32.xlu0 %v1370_v27, %s2208_s9 }
 0xa04   :  { %v2041_v28 = vpop.f32.mrf.mxu0 }
 0xa06   :  { %v1446_v29 = vpop.f32.mrf.mxu1 }
 0xa07   :  { %1470 = vrot.lane.b32.xlu1 %v1446_v29, %s2208_s9 }
 0xa08   :  { %v2046_v30 = vpop.f32.mrf.mxu1 }
 0xa75   :  { %v1469_v37 = vpop.permute.xlu0 %1468 }
 0xa76   :  { %v1480_v38 = vsel %vm1479_vm3, %v1477_v36, %v1469_v37  ;;  %v1623_v36 = vrot.slane %v2283_v10, %v1622_v35 }
 0xa77   :  { %2055 = vmatprep.mubr.msk.f32.mxu0 %vm49_vm0, %v1480_v38 }
 0xa79   :  { %v1471_v41 = vpop.permute.xlu1 %1470 }
 0xa7a   :  { %v1481_v42 = vsel %vm1479_vm3, %v1478_v40, %v1471_v41 }
 0xa7b   :  { %2056 = vmatmul.mubr.msk.f32.vlgmr.msra.gmra.mxu0 %vm49_vm0, %v1481_v42 }
 0xa7c   :  { %2070 = vmatpush3.msra.mxu0 %v1714_v59 }
 0xa7d   :  { %2071 = vmatprep.subr.mxu0 %v1713_v60 }
 0xa7e   :  { %2072 = vmatpush3.msra.mxu0 %v1713_v60 }
 0xa7f   :  { %2073 = vmatprep.subr.mxu0 %v1712_v61 }
 0xa80   :  { %2074 = vmatpush3.msra.mxu0 %v1712_v61 }
 0xa81   :  { %2075 = vmatprep.subr.mxu0 %v1711_v62 }
 0xa82   :  { %2076 = vmatpush3.msra.mxu0 %v1711_v62 }
 0xa83   :  { %2077 = vmatprep.subr.mxu0 %v1710_v31 }
 0xa84   :  { %2078 = vmatpush3.msra.mxu0 %v1710_v31 }
 0xa85   :  { %2079 = vmatprep.subr.mxu0 %v1709_v32 }
 0xa86   :  { %2080 = vmatpush3.msra.mxu0 %v1709_v32 }
 0xa87   :  { %2081 = vmatprep.subr.mxu0 %v1708_v33 }
 0xa88   :  { %2082 = vmatpush3.msra.mxu0 %v1708_v33 }
 0xa89   :  { %2083 = vmatprep.subr.mxu0 %v1707_v34 }
 0xa8a   :  { %2084 = vmatpush3.msra.mxu0 %v1707_v34 }
 0xb3b   :  { %v2057_v46 = vpop.f32.mrf.mxu0 }
 0xb3c   :  { %v1568_v45 = vadd.f32 %v2057_v46, %v1489_v44 }
 0xb3d   :  { %v1562_v47 = vpop.f32.mrf.mxu0 }
 0xb3e   :  { %v2429_v49 = vadd.f32 %v1568_v45, %v2267_v5  ;;  %v1563_v50 = vadd.f32 %v1562_v47, %v1489_v44  ;;  %v1718_v44 = vrot.slane %v2283_v10, %v1717_v43 }
 0xb40   :  { %v1571_v51 = vadd.f32 %v1563_v50, %v2257_v2  ;;  %v1576_v48 = vsel %vm49_vm0, %v2429_v49, 0.0  ;;  %v1583_v55 = vmul.f32 %v2429_v49, %v2429_v49  ;;  %v1619_v2 = vld [vmem:[%s2505_s3 + $0x18] sm:$0xff] }
 0xb41   :  { %1577 = vadd.xlane.f32.xlu1 %v1576_v48  ;;  %2058 = vmatprep.subr.mxu1 %v1619_v2 }
 0xb42   :  { %v1573_v52 = vsel %vm49_vm0, %v1571_v51, 0.0  ;;  %v1582_v53 = vmul.f32 %v1571_v51, %v1571_v51  ;;  %v1587_v5 = vsel %vm49_vm0, %v1583_v55, 0.0  ;;  %2059 = vmatpush3.msra.mxu1 %v1619_v2 }
 0xb43   :  { %1574 = vadd.xlane.f32.xlu0 %v1573_v52  ;;  %2060 = vmatprep.subr.mxu1 %v1618_v56 }
 0xb44   :  { %v1584_v54 = vsel %vm49_vm0, %v1582_v53, 0.0  ;;  %2061 = vmatpush3.msra.mxu1 %v1618_v56 }
 0xb45   :  { %2062 = vmatprep.subr.mxu1 %v1617_v57 }
 0xb46   :  { %2063 = vmatpush3.msra.mxu1 %v1617_v57 }
 0xb47   :  { %1585 = vadd.xlane.f32.xlu0 %v1584_v54  ;;  %2064 = vmatprep.subr.mxu1 %v1616_v58 }
 0xb48   :  { %2065 = vmatpush3.msra.mxu1 %v1616_v58 }
 0xb4b   :  { %1588 = vadd.xlane.f32.xlu0 %v1587_v5 }
 0xbca   :  { %v1578_v6 = vpop.xlane.xlu1 %1577 }
 0xbcb   :  { %v1581_v3 = vmul.f32 0.03125, %v1578_v6 }
 0xbcc   :  { %v1575_v63 = vpop.xlane.xlu0 %1574 }
 0xbcd   :  { %v1580_v0 = vmul.f32 0.03125, %v1575_v63  ;;  %v1595_v12 = vmul.f32 %v1581_v3, %v1581_v3  ;;  %v1593_v15 = vsub.f32 %v2429_v49, %v1581_v3 }
 0xbcf   :  { %v1594_v4 = vmul.f32 %v1580_v0, %v1580_v0  ;;  %v1592_v20 = vsub.f32 %v1571_v51, %v1580_v0 }
 0xbd0   :  { %v1586_v1 = vpop.xlane.xlu0 %1585 }
 0xbd1   :  { %v1590_v7 = vmul.f32 0.03125, %v1586_v1 }
 0xbd3   :  { %v1596_v9 = vsub.f32 %v1590_v7, %v1594_v4  ;;  %v1835_v7 = vsub.s32 6, %v2273_v8 }
 0xbd4   :  { %v1589_v11 = vpop.xlane.xlu0 %1588 }
 0xbd5   :  { %v1598_v14 = vadd.f32 1e-05, %v1596_v9  ;;  %v1591_v13 = vmul.f32 0.03125, %v1589_v11  ;;  %v1841_v9 = vsub.s32 7, %v2273_v8 }
 0xbd7   :  { %2139 = vrsqrt.f32 %v1598_v14  ;;  %v1597_v16 = vsub.f32 %v1591_v13, %v1595_v12  ;;  %v1836_v12 = vrot.slane %v2283_v10, %v1835_v7 }
 0xbd9   :  { %v1599_v17 = vadd.f32 1e-05, %v1597_v16 }
 0xbdb   :  { %2141 = vrsqrt.f32 %v1599_v17  ;;  %v1842_v17 = vrot.slane %v2283_v10, %v1841_v9 }
 0xbe4   :  { %v2140_v22 = vpop.eup %2139 }
 0xbe5   :  { %v1602_v23 = vmul.f32 %v2140_v22, %v1592_v20 }
 0xbe7   :  { %v1608_v25 = vmul.f32 %v1607_v21, %v1602_v23 }
 0xbe8   :  { %v2142_v26 = vpop.eup %2141 }
 0xbe9   :  { %v1603_v27 = vmul.f32 %v2142_v26, %v1593_v15  ;;  %v1614_v28 = vadd.f32 %v1613_v24, %v1608_v25 }
 0xbeb   :  { %v1609_v29 = vmul.f32 %v1607_v21, %v1603_v27  ;;  %2066 = vmatprep.mubr.msk.f32.mxu1 %vm49_vm0, %v1614_v28 }
 0xbed   :  { %v1615_v30 = vadd.f32 %v1613_v24, %v1609_v29 }
 0xbef   :  { %2067 = vmatmul.mubr.msk.f32.vlgmr.msra.gmra.mxu1 %vm49_vm0, %v1615_v30 }
 0xcaf   :  { %v2068_v37 = vpop.f32.mrf.mxu1 }
 0xcb0   :  { %v1702_v38 = vadd.f32 %v2068_v37, %v1623_v36 }
 0xcb1   :  { %v1696_v39 = vpop.f32.mrf.mxu1 }
 0xcb2   :  { %v1697_v40 = vadd.f32 %v1696_v39, %v1623_v36  ;;  %v1706_v42 = vmax.f32 %v1702_v38, 0.0 }
 0xcb4   :  { %v1705_v41 = vmax.f32 %v1697_v40, 0.0 }
 0xcb6   :  { %2085 = vmatprep.mubr.msk.f32.mxu0 %vm1719_vm5, %v1705_v41 }
 0xcb7   :  { %2086 = vmatmul.mubr.msk.f32.vlgmr.msra.gmra.mxu0 %vm1719_vm5, %v1706_v42 }
 0xd77   :  { %v2087_v46 = vpop.f32.mrf.mxu0 }
 0xd78   :  { %v1798_v45 = vadd.f32 %v2087_v46, %v1718_v44 }
 0xd79   :  { %v1792_v47 = vpop.f32.mrf.mxu0 }
 0xd7a   :  { %v1802_v49 = vadd.f32 %v1798_v45, %v1615_v30  ;;  %v1793_v50 = vadd.f32 %v1792_v47, %v1718_v44 }
 0xd7c   :  { %v1801_v51 = vadd.f32 %v1793_v50, %v1614_v28  ;;  %v1806_v48 = vsel %vm49_vm0, %v1802_v49, 0.0  ;;  %v1812_v52 = vmul.f32 %v1802_v49, %v1802_v49 }
 0xd7d   :  { %1807 = vadd.xlane.f32.xlu0 %v1806_v48 }
 0xd7e   :  { %v1803_v53 = vsel %vm49_vm0, %v1801_v51, 0.0  ;;  %v1811_v54 = vmul.f32 %v1801_v51, %v1801_v51  ;;  %v1816_v55 = vsel %vm49_vm0, %v1812_v52, 0.0 }
 0xd7f   :  { %1804 = vadd.xlane.f32.xlu1 %v1803_v53 }
 0xd80   :  { %v1813_v5 = vsel %vm49_vm0, %v1811_v54, 0.0 }
 0xd81   :  { %1817 = vadd.xlane.f32.xlu0 %v1816_v55 }
 0xd83   :  { %1814 = vadd.xlane.f32.xlu1 %v1813_v5 }
 0xe06   :  { %v1808_v2 = vpop.xlane.xlu0 %1807 }
 0xe07   :  { %v1810_v56 = vmul.f32 0.03125, %v1808_v2 }
 0xe08   :  { %v1805_v57 = vpop.xlane.xlu1 %1804 }
 0xe09   :  { %v1809_v58 = vmul.f32 0.03125, %v1805_v57  ;;  %v1824_v60 = vmul.f32 %v1810_v56, %v1810_v56  ;;  %v1822_v11 = vsub.f32 %v1802_v49, %v1810_v56 }
 0xe0a   :  { %v1818_v59 = vpop.xlane.xlu0 %1817 }
 0xe0b   :  { %v1820_v61 = vmul.f32 0.03125, %v1818_v59  ;;  %v1823_v63 = vmul.f32 %v1809_v58, %v1809_v58  ;;  %v1821_v13 = vsub.f32 %v1801_v51, %v1809_v58 }
 0xe0c   :  { %v1815_v62 = vpop.xlane.xlu1 %1814 }
 0xe0d   :  { %v1826_v0 = vsub.f32 %v1820_v61, %v1824_v60  ;;  %v1819_v6 = vmul.f32 0.03125, %v1815_v62 }
 0xe0f   :  { %v1828_v1 = vadd.f32 1e-05, %v1826_v0  ;;  %v1825_v3 = vsub.f32 %v1819_v6, %v1823_v63 }
 0xe11   :  { %2143 = vrsqrt.f32 %v1828_v1  ;;  %v1827_v4 = vadd.f32 1e-05, %v1825_v3 }
 0xe13   :  { %2145 = vrsqrt.f32 %v1827_v4 }
 0xe1e   :  { %v2144_v14 = vpop.eup %2143 }
 0xe1f   :  { %v1832_v16 = vmul.f32 %v2144_v14, %v1822_v11 }
 0xe20   :  { %v2146_v18 = vpop.eup %2145 }
 0xe21   :  { %v1831_v19 = vmul.f32 %v2146_v18, %v1821_v13  ;;  %v1838_v20 = vmul.f32 %v1836_v12, %v1832_v16 }
 0xe23   :  { %v1837_v21 = vmul.f32 %v1836_v12, %v1831_v19  ;;  %v1844_v22 = vadd.f32 %v1842_v17, %v1838_v20 }
 0xe25   :  { %v1843_v23 = vadd.f32 %v1842_v17, %v1837_v21  ;;  %1846 = vst.msk [vmem:[#allocation5 + $0x8] sm:$0xff] %vm49_vm0, %v1844_v22 }
 0xe27   :  { %1845 = vst.msk [vmem:[#allocation5] sm:$0xff] %vm49_vm0, %v1843_v23 }
 0xe28   :  { %2178 = shalt.err (!%p2175_p9)
}
 0xe29   :  { %1858 = dma.vmem_to_hbm [thread:$0]  %s1853_s7, 256, %s2508_s6, [#allocation4], %s2192_s24, %s2192_s24, %s2193_s25  }
 0xe2a   :  { %2189 = dma.done.wait [#allocation4], 256  }
 0xe2b   :  { %2190 = vsyncadd [#allocation4], 4294967040 }
 0xe2c   :  { %1862 = vsyncpa [#allocation3], 1 }
 0xe2d   :  { %1863 = vsyncpa [#allocation4], 1 }

</bundles_post_ra>
